<compile_context>
chip_gen: v6e
topology: v6e:2x2x1
jax: 0.10.0
libtpu: 0.0.40
codegen_flags: <defaults>
</compile_context>

<pallas_src>
import math

import jax
import jax.numpy as jnp
from jax.experimental import pallas as pl
from jax.experimental.pallas import tpu as pltpu


def _merge_style_kernel(feat_ref, x_ref, o_ref):
    # feat_ref: (row_tile, 1)       per-row (batch*channel) offset, x.dtype
    # x_ref:    (row_tile, hw_tile) streamed feature-map tile
    # o_ref:    (row_tile, hw_tile)
    o_ref[...] = x_ref[...] + feat_ref[...]


def _round_up(x, m):
    return ((x + m - 1) // m) * m


def _project_style(style, weight, bias, out_dtype):
    # Tiny (B, S) x (S, C) projection, f32 accumulate, cast to x.dtype.
    feat = (style.astype(jnp.float32) @ weight.astype(jnp.float32).T
            + bias.astype(jnp.float32))
    return feat.astype(out_dtype)                              # (B, C)


def merge_style(x, style, weight, bias, *, hw_tile=4096, row_tile=256,
                min_kernel_bytes=256 * 1024, donate_x=False):
    """MergeStyle forward: x + Linear(style) broadcast over spatial dims.

    x: (B, C, *spatial), style: (B, S), weight: (C, S), bias: (C,).
    """
    B, C = x.shape[0], x.shape[1]
    spatial = x.shape[2:]
    hw = int(math.prod(spatial)) if spatial else 1
    rows = B * C

    feat = _project_style(style, weight, bias, x.dtype)        # (B, C)

    itemsize = jnp.dtype(x.dtype).itemsize
    total_bytes = rows * hw * itemsize

    # Small-input / narrow-HW fallback: a (1,1)-grid pallas_call has fixed
    # launch + DMA overhead, and hw < 128 inflates traffic by the lane
    # padding; XLA fuses the broadcast add at full bandwidth for these sizes.
    if hw < 128 or total_bytes < min_kernel_bytes:
        newshape = feat.shape + (1,) * (x.ndim - 2)
        return x + feat.reshape(newshape)

    feat = feat.reshape(rows, 1)                               # (B*C, 1)
    x2 = x.reshape(rows, hw)          # lane/sublane-dense slab (view, no copy)

    # Sublane multiple depends on dtype packing (f32: 8, bf16: 16, int8: 32);
    # max() guard keeps 8-byte dtypes at 8 instead of 0.
    sub = 8 * max(4 // itemsize, 1)

    # Tile sizes: lane tile a multiple of 128, row tile a multiple of `sub`,
    # clamped to the rounded-up array extents.  No jnp.pad: the grid is
    # cdiv-ragged and Pallas masks the edge blocks (OOB output writes dropped).
    hw_128 = _round_up(hw, 128)
    rows_sub = _round_up(rows, sub)
    hw_tile = max(128, _round_up(min(hw_tile, hw_128), 128))
    row_tile = max(sub, _round_up(min(row_tile, rows_sub), sub))

    n_row_blk = pl.cdiv(rows, row_tile)
    n_hw_blk = pl.cdiv(hw, hw_tile)

    # v7x has 2 TensorCores/chip: guarantee >= 2 blocks on one "parallel" axis
    # so the second core is not idle (no-op on v5e/v6e, which have 1 TC).
    if n_row_blk == 1 and n_hw_blk == 1:
        if hw_128 >= 2 * 128:
            hw_tile = _round_up(pl.cdiv(hw_128, 2), 128)
            n_hw_blk = pl.cdiv(hw, hw_tile)
        elif rows_sub >= 2 * sub:
            row_tile = _round_up(pl.cdiv(rows_sub, 2), sub)
            n_row_blk = pl.cdiv(rows, row_tile)

    grid = (n_row_blk, n_hw_blk)

    # VMEM budget: double-buffered in + out blocks plus slack, capped well
    # under v7x's 64 MiB per-core VMEM, and above the 16 MiB v5e scoped default.
    block_bytes = row_tile * hw_tile * itemsize
    vmem_limit = int(min(48 * 1024 * 1024,
                         max(4 * block_bytes + (2 << 20), 16 * 1024 * 1024)))

    cost = pl.CostEstimate(
        flops=rows * hw,
        transcendentals=0,
        bytes_accessed=2 * rows * hw * itemsize + rows * itemsize,
    )

    out = pl.pallas_call(
        _merge_style_kernel,
        out_shape=jax.ShapeDtypeStruct((rows, hw), x.dtype),
        grid_spec=pltpu.PrefetchScalarGridSpec(
            num_scalar_prefetch=0,
            grid=grid,
            in_specs=[
                # feat block is constant across the HW axis -> no re-DMA.
                pl.BlockSpec((row_tile, 1), lambda i, j: (i, 0)),
                pl.BlockSpec((row_tile, hw_tile), lambda i, j: (i, j)),
            ],
            out_specs=pl.BlockSpec((row_tile, hw_tile), lambda i, j: (i, j)),
        ),
        compiler_params=pltpu.CompilerParams(
            dimension_semantics=("parallel", "parallel"),
            vmem_limit_bytes=vmem_limit,
        ),
        cost_estimate=cost,
        # Donate x's HBM buffer only when the caller allows in-place semantics.
        input_output_aliases=({1: 0} if donate_x else {}),
    )(feat, x2)

    return out.reshape(x.shape)


def _reference(x, style, weight, bias):
    feat = _project_style(style, weight, bias, x.dtype)
    newshape = feat.shape + (1,) * (x.ndim - 2)
    return x + feat.reshape(newshape)


if __name__ == "__main__":
    key = jax.random.PRNGKey(0)
    kx, ks, kw, kb, kx2, ks2, kx3 = jax.random.split(key, 7)

    # Test 1: module-consistent shapes (dim=C=4, style_channels=8), kernel path.
    B, C, H, W = 2, 4, 16, 16
    S = 8
    bound = 1.0 / math.sqrt(S)
    x = jax.random.normal(kx, (B, C, H, W), dtype=jnp.float32)
    style = jax.random.normal(ks, (B, S), dtype=jnp.float32)
    weight = jax.random.uniform(kw, (C, S), jnp.float32, -bound, bound)
    bias = jax.random.uniform(kb, (C,), jnp.float32, -bound, bound)

    out = jax.block_until_ready(
        merge_style(x, style, weight, bias, min_kernel_bytes=0))
    ref = _reference(x, style, weight, bias)
    assert out.shape == x.shape
    assert jnp.allclose(out, ref, atol=1e-5, rtol=1e-5), "mismatch (test 1)"

    # Test 2: odd, non-aligned 3-D spatial shape -> exercises ragged edge
    # blocks on both grid axes (rows=10, hw=189) with no padding copies.
    C2, D2, H2, W2 = 5, 3, 7, 9
    x_b = jax.random.normal(kx2, (B, C2, D2, H2, W2), dtype=jnp.float32)
    style_b = jax.random.normal(ks2, (B, S), dtype=jnp.float32)
    weight_b = jax.random.uniform(kw, (C2, S), jnp.float32, -bound, bound)
    bias_b = jax.random.uniform(kb, (C2,), jnp.float32, -bound, bound)

    out_b = jax.block_until_ready(
        merge_style(x_b, style_b, weight_b, bias_b, min_kernel_bytes=0))
    ref_b = _reference(x_b, style_b, weight_b, bias_b)
    assert out_b.shape == x_b.shape
    assert jnp.allclose(out_b, ref_b, atol=1e-5, rtol=1e-5), "mismatch (test 2)"

    # Test 3: tiny spatial extent -> exercises the plain-XLA fallback path.
    x_c = jax.random.normal(kx3, (B, C, 4, 4), dtype=jnp.float32)
    out_c = jax.block_until_ready(merge_style(x_c, style, weight, bias))
    ref_c = _reference(x_c, style, weight, bias)
    assert jnp.allclose(out_c, ref_c, atol=1e-5, rtol=1e-5), "mismatch (test 3)"

    print("KERNEL_OK")
</pallas_src>

<mosaic_0001>
module attributes {stable_mosaic.version = 11 : i64} {
  func.func @_merge_style_kernel(%arg0: i32, %arg1: i32, %arg2: memref<8x1xf32, #tpu.memory_space<vmem>>, %arg3: memref<8x128xf32, #tpu.memory_space<vmem>>, %arg4: memref<8x128xf32, #tpu.memory_space<vmem>>) attributes {dimension_semantics = [#tpu.dimension_semantics<parallel>, #tpu.dimension_semantics<parallel>], iteration_bounds = array<i64: 1, 2>, scalar_prefetch = 0 : i64, scratch_operands = 0 : i64, tpu.core_type = #tpu.core_type<tc>, window_params = [{transform_indices = @transform_0, window_bounds = array<i64: 8, 1>}, {transform_indices = @transform_1, window_bounds = array<i64: 8, 128>}, {transform_indices = @transform_2, window_bounds = array<i64: 8, 128>}]} {
    %c0 = arith.constant 0 : index
    %c0_0 = arith.constant 0 : index
    %0 = vector.load %arg3[%c0, %c0_0] : memref<8x128xf32, #tpu.memory_space<vmem>>, vector<8x128xf32>
    %c0_1 = arith.constant 0 : index
    %c0_2 = arith.constant 0 : index
    %1 = vector.load %arg2[%c0_1, %c0_2] : memref<8x1xf32, #tpu.memory_space<vmem>>, vector<8x1xf32>
    %2 = vector.broadcast %1 : vector<8x1xf32> to vector<8x128xf32>
    %3 = arith.addf %0, %2 : vector<8x128xf32>
    %c0_3 = arith.constant 0 : index
    %c0_4 = arith.constant 0 : index
    %4 = vector.load %arg4[%c0_3, %c0_4] : memref<8x128xf32, #tpu.memory_space<vmem>>, vector<8x128xf32>
    tpu.vector_store %arg4[%c0_3, %c0_4], %3 {strides = array<i32>} : memref<8x128xf32, #tpu.memory_space<vmem>>, vector<8x128xf32>,
    return
  }
  func.func @transform_0(%arg0: i32, %arg1: i32) -> (i32, i32) {
    %c0_i32 = arith.constant 0 : i32
    %c0_i32_0 = arith.constant 0 : i32
    return %arg0, %c0_i32 : i32, i32
  }
  func.func @transform_1(%arg0: i32, %arg1: i32) -> (i32, i32) {
    %c0_i32 = arith.constant 0 : i32
    return %arg0, %arg1 : i32, i32
  }
  func.func @transform_2(%arg0: i32, %arg1: i32) -> (i32, i32) {
    %c0_i32 = arith.constant 0 : i32
    return %arg0, %arg1 : i32, i32
  }
}

</mosaic_0001>

<bundles_post_ra>
// kernel: tpu_custom_call.1
= control target key start
LH: loop header
LB: loop body
LE: loop exit
PB: predicated region body
PF: predicated region fallthrough
CT: control target
= control target key end

     0   :  { %7 = vsyncpa [#allocation3], 0  ;;  %s659_s0 = inlined_call_operand.vmem [shape: f32[8,1], index: 0, kind: input, shape index: {}]   ;;  %s660_s1 = inlined_call_operand.hbm [shape: f32[8,256], index: 1, kind: input, shape index: {}]   ;;  %s661_s2 = inlined_call_operand.hbm [shape: f32[8,256], index: 2, kind: output, shape index: {}]  }
   0x1   :  { %9 = vsyncpa [#allocation3 + $0x1], 0 }
   0x2   :  { %10 = vsyncpa [#allocation4], 0 }
   0x3   :  { %12 = vsyncpa [#allocation4 + $0x1], 0  ;;  %s522_s9 = smov 0   ;;  %s524_s10 = smov 0  }
   0x4   :  { %s526_s11 = smov 0   ;;  %s528_s12 = smov 0  }
   0x5   :  { %s530_s13 = smov 0   ;;  %s532_s14 = smov 0  }
   0x6 LB: > { %s316_s15 = sadd.s32 4294967295, %s502_s14   ;;  %s317_s16 = sadd.s32 4294967294, %s502_s14   ;;  %s502_s14 = sphi %s532_s14, %s18_s14   ;;  %s498_s13 = sphi %s530_s13, %s673_s13   ;;  %s494_s12 = sphi %s528_s12, %s672_s12   ;;  %s490_s11 = sphi %s526_s11, %s671_s11   ;;  %s486_s10 = sphi %s524_s10, %s670_s10   ;;  %s482_s9 = sphi %s522_s9, %s669_s9  }
   0x7   : > { %s27_s17 = sadd.s32 1, %s498_s13  ;;  %s65_s18 = sadd.s32 1, %s490_s11 }
   0x8   : > { %p28_p0 = scmp.ge.s32.totalorder %s27_s17, 2  ;;  %p72_p1 = scmp.ne.s32.totalorder %s490_s11, %s486_s10 }
   0x9   : > { %p73_p2 = scmp.eq.s32.totalorder %s502_s14, 0  ;;  %p78_p3 = scmp.ne.s32.totalorder %s486_s10, %s482_s9 }
   0xa   : > { %s675_s17 = smov (%p28_p0, %s27_s17), 0  ;;  %p79_p5 = scmp.eq.s32.totalorder %s316_s15, 0 }
   0xb   : > { %p563_p4 = por %p73_p2, %p72_p1  ;;  %s61_s20 = ssub.s32 %s498_s13, %s675_s17 }
   0xc   : > { %p104_p6 = scmp.eq.s32.totalorder %s316_s15, 1  ;;  %p63_p7 = scmp.eq.s32.totalorder %s61_s20, 0 }
   0xd   : > { %p569_p8 = por %p79_p5, %p78_p3  ;;  %p110_p10 = scmp.eq.s32.totalorder %s317_s16, 1 }
   0xe   : > { %p573_p9 = por %p104_p6, %p72_p1  ;;  %p342_p13 = scmp.lt.s32.totalorder %s502_s14, 2 }
   0xf   : > { %s578_s23 = scalar_select %p63_p7, %s490_s11, %s65_s18  }
  0x10   : > { %p580_p11 = por %p110_p10, %p78_p3  ;;  %s137_s25 = sand.u32 1, %s490_s11  }
  0x11   : > { %s321_s26 = sshll.u32 %s137_s25, 3  ;;  %s322_s27 = sshll.u32 %s498_s13, 7 }
  0x12   : > { %s665_s24 = scalar_select %p580_p11, 1, 0 }
  0x13   : > { %s148_s30 = scalar_lea.hbm %s660_s1, %s322_s27  ;;  %s141_s3 = scalar_lea.vmem [#allocation2], %s321_s26 }
  0x14   : > { %s150_s4 = sshll.u32 %s141_s3, 4  ;;  %p593_p0 = pnand %p342_p13, %p563_p4  ;;  %s151_s4 = int_to_ptr.vmem [resolvable:$true] %s150_s4 }
  0x15   : > { %p323_p1 = scmp.ge.s32.totalorder %s502_s14, 1  ;;  %p155_p2 = scmp.lt.s32.totalorder %s502_s14, 3 }
  0x16   : > { %s138_s6 = scalar_lea.sflag [#allocation3], %s137_s25  ;;  %p396_p3 = pneg %p593_p0 }
  0x17   : > { %s407_s7 = scalar_lea.vmem %s151_s4, 128  ;;  %s504_s8 = smov [#allocation2]  }
  0x18   : > { %p408_p5 = scmp.ne.s32.totalorder %s151_s4, %s407_s7  ;;  %s412_s15 = sshll.u32 %s504_s8, 4  ;;  %s413_s15 = int_to_ptr.vmem [resolvable:$false] %s412_s15 }
  0x19   : > { %s414_s16 = scalar_lea.vmem %s413_s15, 256  ;;  %p415_p10 = scmp.lt.s32.totalorder %s151_s4, %s413_s15 }
  0x1a   : > { %p410_p6 = pnand %p408_p5, %p396_p3  ;;  %p416_p12 = scmp.lt.s32.totalorder %s414_s16, %s407_s7 }
  0x1c   : > { %p411_p7 = pneg %p410_p6  ;;  %p417_p4 = por %p416_p12, %p415_p10 }
  0x1e   : > { %p418_p13 = pnand %p417_p4, %p411_p7 }
  0x20   : > { %421 = shalt.err (!%p418_p13)
}
  0x21   : > { %337 = dma.hbm_to_vmem [thread:$0]  (!%p593_p0), %s148_s30, 128, %s151_s4, %s138_s6  }
  0x22   : > { %p156_p11 = pnand %p323_p1, %p155_p2 }
  0x23   : > { %s608_s18 = sand.u32 (!%p156_p11), 1, %s486_s10  }
  0x24   : > { %159 = sbr.rel (%p156_p11) target bundleno = 183 (0xb7), region = 28  ;;  %s324_s19 = sshll.u32 (!%p156_p11), %s608_s18, 3 }
  0x25   : > { %s162_s20 = scalar_lea.sflag (!%p156_p11), [#allocation3], %s608_s18  ;;  %s165_s25 = scalar_lea.vmem (!%p156_p11), [#allocation2], %s324_s19 }
  0x29   : > { %473 = dma.done.wait (%p569_p8), %s162_s20, 128  }
  0x2a   : > { %475 = vsyncadd (%p569_p8), %s162_s20, 4294967168  ;;  %v505_v0 = vmov 0   ;;  %v195_v1 = vld [vmem:[%s659_s0] sm:$0xff]  ;;  %s327_s28 = sshll.u32 %s494_s12, 7  ;;  %s189_s29 = scalar_lea.vmem [#allocation5], %s324_s19 }
  0x2b   : > { %393 = vset.pattern.permute.xlu0 %v505_v0  ;;  %v194_v2 = vld [vmem:[%s165_s25] sm:$0xff]  ;;  %s219_s30 = sshll.u32 %s189_s29, 4  ;;  %s217_s21 = scalar_lea.hbm %s661_s2, %s327_s28  ;;  %s220_s30 = int_to_ptr.vmem [resolvable:$true] %s219_s30 }
  0x2c   : > { %198 = vperm.xlu0 %393, %v195_v1   ;;  %s204_s5 = scalar_lea.sflag [#allocation4], %s608_s18  ;;  %s422_s6 = scalar_lea.vmem %s220_s30, 128 }
  0x2d   : > { %p423_p8 = scmp.ne.s32.totalorder %s220_s30, %s422_s6  ;;  %s506_s7 = smov [#allocation5]  }
  0x2e   : > { %s426_s8 = sshll.u32 %s506_s7, 4  ;;  %s427_s8 = int_to_ptr.vmem [resolvable:$false] %s426_s8 }
  0x2f   : > { %p424_p11 = pnand %p423_p8, %p573_p9  ;;  %s428_s12 = scalar_lea.vmem %s427_s8, 256 }
  0x30   : > { %p429_p0 = scmp.lt.s32.totalorder %s220_s30, %s427_s8  ;;  %p430_p1 = scmp.lt.s32.totalorder %s428_s12, %s422_s6 }
  0x31   : > { %p425_p12 = pneg %p424_p11 }
  0x32   : > { %p431_p2 = por %p430_p1, %p429_p0 }
  0x34   : > { %p432_p3 = pnand %p431_p2, %p425_p12 }
  0xa7   : > { %v199_v3 = vpop.permute.xlu0 %198 }
  0xa8   : > { %v201_v4 = vadd.f32 %v199_v3, %v194_v2 }
  0xaa   : > { %202 = vst [vmem:[%s189_s29] sm:$0xff] %v201_v4 }
  0xab   : > { %435 = shalt.err (!%p432_p3)
}
  0xac   : > { %s436_s15 = scalar_lea.hbm %s217_s21, 128  ;;  %s440_s19 = scalar_lea.hbm %s661_s2, 256 }
  0xad   : > { %p437_p5 = scmp.ne.s32.totalorder %s217_s21, %s436_s15  ;;  %p441_p10 = scmp.lt.s32.totalorder %s217_s21, %s661_s2 }
  0xae   : > { %p442_p4 = scmp.lt.s32.totalorder %s440_s19, %s436_s15 }
  0xaf   : > { %p438_p6 = pnand %p437_p5, %p573_p9 }
  0xb0   : > { %p443_p13 = por %p442_p4, %p441_p10 }
  0xb1   : > { %p439_p7 = pneg %p438_p6 }
  0xb3   : > { %p444_p8 = pnand %p443_p13, %p439_p7 }
  0xb5   : > { %447 = shalt.err (!%p444_p8)
}
  0xb6   : > { %332 = dma.vmem_to_hbm [thread:$0]  (%p573_p9), %s220_s30, 128, %s217_s21, %s204_s5  }
  0xb7 PF: > { %s231_s26 = sand.u32 1, %s482_s9   ;;  %p667_p11 = scmp.ne.s32.totalorder %s665_s24, 0 }
  0xb8   : > { %p668_p12 = scmp.ge.s32.totalorder %s502_s14, 2  ;;  %s232_s27 = scalar_lea.sflag [#allocation4], %s231_s26 }
  0xba   : > { %p339_p0 = pnand %p668_p12, %p667_p11 }
  0xbc   : > { %p340_p1 = pneg %p339_p0 }
  0xbe   : > { %477 = dma.done.wait (%p340_p1), %s232_s27, 128  }
  0xbf   : > { %479 = vsyncadd (%p340_p1), %s232_s27, 4294967168  ;;  %s18_s14 = sadd.s32 1, %s502_s14   ;;  %s669_s9 = smov %s486_s10 }
  0xc0   : > { %p15_p2 = scmp.ge.s32.totalorder %s18_s14, 4   ;;  %s670_s10 = smov %s490_s11 }
  0xc1   : > { %s671_s11 = smov %s578_s23  ;;  %s672_s12 = smov %s498_s13 }
  0xc2   : > { %s673_s13 = smov %s675_s17  ;;  %17 = sbr.rel (!%p15_p2) target bundleno = 6 (0x6), region = 76 }
  0xc7   :  { %237 = vsyncpa [#allocation3], 1 }
  0xc8   :  { %239 = vsyncpa [#allocation3 + $0x1], 1 }
  0xc9   :  { %240 = vsyncpa [#allocation4], 1 }
  0xca   :  { %242 = vsyncpa [#allocation4 + $0x1], 1 }

</bundles_post_ra>
